<compile_context>
chip_gen: v5e
topology: v5e:2x2
jax: 0.10.0
libtpu: 0.0.40
codegen_flags: <defaults>
</compile_context>

<pallas_src>
import jax
import jax.numpy as jnp
from jax.experimental import pallas as pl
from jax.experimental.pallas import tpu as pltpu


_TM = 256                # target rows per M block (raise toward 512-1024 for very large batch)
_FAST_MAX_K = 1024       # single-K-block fast-path ceiling (input features)
_FAST_MAX_N = 1024       # single-N-block fast-path ceiling (output features)
_TK = 512                # general-path K tile (multiple of 256 for v6e/v7x MXU)
_TN = 256                # general-path N tile
_MEGACORE_MIN_ROWS = 64  # split M into >=2 blocks past this (v7x second TC)


def _round_up(x, m):
    return ((x + m - 1) // m) * m


def _pick_m_tile(b, tm=_TM):
    """M tile: <= tm rows, multiple of 8 (or the full extent).

    Padding waste is bounded by one sublane (<8 rows) per block instead of a
    whole tile.  For b >= _MEGACORE_MIN_ROWS the grid is forced to >= 2 blocks
    so the M ("parallel") axis can be core-sharded on v7x.
    """
    min_blocks = 2 if b >= _MEGACORE_MIN_ROWS else 1
    n_blocks = max(min_blocks, pl.cdiv(b, tm))
    if n_blocks <= 1:
        return b, 1                        # full-extent block: no sublane rule
    tm_eff = _round_up(pl.cdiv(b, n_blocks), 8)
    return tm_eff, pl.cdiv(b, tm_eff)


# ----------------------------------------------------------------------------
# Kernels
# ----------------------------------------------------------------------------
def _matmul_relu_kernel(x_ref, w_ref, o_ref):
    """Fast path: whole K and N in one block -> y = relu(x @ w), no scratch."""
    x = x_ref[...]
    w = w_ref[...]
    if x.dtype != w.dtype:            # optional bf16-weight path: cast on the VPU
        x = x.astype(w.dtype)
    y = jnp.dot(x, w, preferred_element_type=jnp.float32)
    o_ref[...] = jnp.maximum(y, 0.0).astype(o_ref.dtype)


def _matmul_relu_acc_kernel(x_ref, w_ref, o_ref):
    """General path: accumulate straight into the resident f32 output block."""
    k = pl.program_id(2)

    @pl.when(k == 0)
    def _():
        o_ref[...] = jnp.zeros_like(o_ref)

    x = x_ref[...]
    w = w_ref[...]
    if x.dtype != w.dtype:
        x = x.astype(w.dtype)
    o_ref[...] += jnp.dot(x, w, preferred_element_type=jnp.float32)

    @pl.when(k == pl.num_programs(2) - 1)
    def _():
        o_ref[...] = jnp.maximum(o_ref[...], 0.0)   # ReLU in place, last K step


# ----------------------------------------------------------------------------
# Wrappers
# ----------------------------------------------------------------------------
@jax.jit
def _linear_relu_fast(x, wt):
    """relu(x @ wt) with a pre-transposed (d_in, d_out) weight; one K/N block."""
    b, d_in = x.shape
    k_w, d_out = wt.shape
    assert d_in == k_w, (d_in, k_w)

    tm_eff, grid_m = _pick_m_tile(b)

    cost = pl.CostEstimate(
        flops=2 * b * d_in * d_out,
        transcendentals=0,
        bytes_accessed=(x.dtype.itemsize * b * d_in
                        + wt.dtype.itemsize * d_in * d_out
                        + x.dtype.itemsize * b * d_out),
    )

    return pl.pallas_call(
        _matmul_relu_kernel,
        out_shape=jax.ShapeDtypeStruct((b, d_out), x.dtype),
        grid=(grid_m,),
        in_specs=[
            pl.BlockSpec((tm_eff, d_in), lambda i: (i, 0)),
            pl.BlockSpec((d_in, d_out), lambda i: (0, 0)),   # resident weight
        ],
        out_specs=pl.BlockSpec((tm_eff, d_out), lambda i: (i, 0)),
        compiler_params=pltpu.CompilerParams(
            dimension_semantics=("parallel",)),
        cost_estimate=cost,
    )(x, wt)


@jax.jit
def _linear_relu_tiled(x, wt_pad):
    """General fallback for very large feature dims (not hit by NetAdv's real
    shapes).  (M, N, K) grid; accumulates into the resident f32 o_ref."""
    b, d_in = x.shape
    kp, d_out = wt_pad.shape
    assert kp % _TK == 0 and d_in <= kp

    # Zero-pad x's K tail (the weight's K rows were zero-padded once at init);
    # the pad must be real zeros so garbage can never reach valid outputs.
    if d_in < kp:
        x = jnp.pad(x, ((0, 0), (0, kp - d_in)))

    tm_eff, grid_m = _pick_m_tile(b)
    tn_eff = d_out if d_out <= _TN else _TN
    grid_n = pl.cdiv(d_out, tn_eff)
    grid_k = kp // _TK

    cost = pl.CostEstimate(
        flops=2 * b * kp * d_out,
        transcendentals=0,
        bytes_accessed=(x.dtype.itemsize * grid_n * b * kp            # x re-read per N block
                        + wt_pad.dtype.itemsize * grid_m * kp * d_out  # w re-read per M block
                        + 4 * b * d_out),
    )

    return pl.pallas_call(
        _matmul_relu_acc_kernel,
        out_shape=jax.ShapeDtypeStruct((b, d_out), jnp.float32),
        grid=(grid_m, grid_n, grid_k),
        in_specs=[
            pl.BlockSpec((tm_eff, _TK), lambda i, j, k: (i, k)),
            pl.BlockSpec((_TK, tn_eff), lambda i, j, k: (k, j)),
        ],
        out_specs=pl.BlockSpec((tm_eff, tn_eff), lambda i, j, k: (i, j)),
        compiler_params=pltpu.CompilerParams(
            dimension_semantics=("parallel", "parallel", "arbitrary"),
            vmem_limit_bytes=32 * 1024 * 1024),
        cost_estimate=cost,
    )(x, wt_pad)


def _prepare_branch(w, param_dtype):
    """PyTorch (out, in) weight -> transposed (in, out), once at init.

    Fast-path branches stay unpadded (full-extent blocks need no padding);
    tiled branches get their K axis zero-padded to a _TK multiple once.
    """
    d_out, d_in = w.shape
    wt = jnp.asarray(w, param_dtype).T
    if d_in <= _FAST_MAX_K and d_out <= _FAST_MAX_N:
        return ("fast", wt)
    kp = _round_up(d_in, _TK)
    wt_pad = jnp.zeros((kp, d_out), param_dtype).at[:d_in, :].set(wt)
    return ("tiled", wt_pad)


def _apply_branch(x, branch):
    kind, wt = branch
    if kind == "fast":
        return _linear_relu_fast(x, wt)
    return _linear_relu_tiled(x, wt)


class NetAdvPallas:
    """Pallas re-implementation of FairLM NetAdv (forward only)."""

    def __init__(self, input_emb_size, output_emb_size, key,
                 param_dtype=jnp.float32):
        # TODO(synk): param_dtype=jnp.bfloat16 gives ~2-4x MXU throughput and
        # halves weight HBM bytes on v6e/v7x at the cost of exact f32 parity
        # with the PyTorch reference (kept f32 by default).
        # TODO(synk): for v7x with tiny batches, stacking wt_query/wt_concat
        # along N in one pallas_call would give the second TC a block; their K
        # dims differ, so it needs a pad/gather scheme — skipped.
        k1, k2 = jax.random.split(key)
        bound_q = 1.0 / (input_emb_size ** 0.5)
        bound_c = 1.0 / ((output_emb_size * 2) ** 0.5)
        self.w_query = jax.random.uniform(
            k1, (output_emb_size, input_emb_size), jnp.float32,
            minval=-bound_q, maxval=bound_q)
        self.w_concat = jax.random.uniform(
            k2, (output_emb_size, output_emb_size * 2), jnp.float32,
            minval=-bound_c, maxval=bound_c)
        self._q = _prepare_branch(self.w_query, param_dtype)
        self._c = _prepare_branch(self.w_concat, param_dtype)

    def __call__(self, x, name):
        if name == "query":
            return _apply_branch(x, self._q)
        elif name == "concat":
            return _apply_branch(x, self._c)
        return x   # PyTorch: unknown name passes x through untouched


if __name__ == "__main__":
    key = jax.random.PRNGKey(0)
    (k_m1, k_m2, k_m3, k_xq, k_xc,
     k_xq2, k_xc2, k_xq3, _) = jax.random.split(key, 9)

    def _ref(x, w):
        return jnp.maximum(
            jnp.dot(x, w.T, precision=jax.lax.Precision.HIGHEST), 0.0)

    # --- 1. Module-typical small shapes (fast path, single block) -----------
    input_emb_size, output_emb_size, batch = 32, 32, 8
    net = NetAdvPallas(input_emb_size, output_emb_size, k_m1)
    x_query = jax.random.normal(k_xq, (batch, input_emb_size), jnp.float32)
    x_concat = jax.random.normal(k_xc, (batch, 2 * output_emb_size), jnp.float32)

    y_query = net(x_query, "query")
    y_concat = net(x_concat, "concat")
    y_other = net(x_query, "other_name")          # passthrough branch
    jax.block_until_ready((y_query, y_concat))

    assert y_query.shape == (batch, output_emb_size)
    assert y_concat.shape == (batch, output_emb_size)
    assert y_other is x_query
    assert jnp.allclose(y_query, _ref(x_query, net.w_query), atol=1e-4, rtol=1e-4)
    assert jnp.allclose(y_concat, _ref(x_concat, net.w_concat), atol=1e-4, rtol=1e-4)

    # --- 2. Non-aligned sizes: multi-M-block fast path with masked M tail ---
    in2, out2, b2 = 640, 300, 260       # grid_m = 2 (2 x 136 rows), full K/N blocks
    net2 = NetAdvPallas(in2, out2, k_m2)
    xq2 = jax.random.normal(k_xq2, (b2, in2), jnp.float32)
    xc2 = jax.random.normal(k_xc2, (b2, 2 * out2), jnp.float32)
    yq2 = net2(xq2, "query")
    yc2 = net2(xc2, "concat")
    jax.block_until_ready((yq2, yc2))
    assert yq2.shape == (b2, out2) and yc2.shape == (b2, out2)
    assert jnp.allclose(yq2, _ref(xq2, net2.w_query), atol=1e-3, rtol=1e-3)
    assert jnp.allclose(yc2, _ref(xc2, net2.w_concat), atol=1e-3, rtol=1e-3)

    # --- 3. Oversized input features: general tiled path (K grid length 3) --
    in3, out3, b3 = 1300, 64, 24
    net3 = NetAdvPallas(in3, out3, k_m3)
    xq3 = jax.random.normal(k_xq3, (b3, in3), jnp.float32)
    yq3 = net3(xq3, "query")
    jax.block_until_ready(yq3)
    assert yq3.shape == (b3, out3)
    assert jnp.allclose(yq3, _ref(xq3, net3.w_query), atol=2e-3, rtol=2e-3)

    print("KERNEL_OK")
</pallas_src>

<mosaic_0001>
module attributes {stable_mosaic.version = 11 : i64} {
  func.func @_matmul_relu_kernel(%arg0: i32, %arg1: memref<8x32xf32, #tpu.memory_space<vmem>>, %arg2: memref<32x32xf32, #tpu.memory_space<vmem>>, %arg3: memref<8x32xf32, #tpu.memory_space<vmem>>) attributes {dimension_semantics = [#tpu.dimension_semantics<parallel>], iteration_bounds = array<i64: 1>, scalar_prefetch = 0 : i64, scratch_operands = 0 : i64, tpu.core_type = #tpu.core_type<tc>, window_params = [{transform_indices = @transform_0, window_bounds = array<i64: 8, 32>}, {pipeline_mode = #tpu.pipeline_mode<synchronous>, transform_indices = @transform_1, window_bounds = array<i64: 32, 32>}, {transform_indices = @transform_2, window_bounds = array<i64: 8, 32>}]} {
    %c0 = arith.constant 0 : index
    %c0_0 = arith.constant 0 : index
    %0 = vector.load %arg1[%c0, %c0_0] : memref<8x32xf32, #tpu.memory_space<vmem>>, vector<8x32xf32>
    %c0_1 = arith.constant 0 : index
    %c0_2 = arith.constant 0 : index
    %1 = vector.load %arg2[%c0_1, %c0_2] : memref<32x32xf32, #tpu.memory_space<vmem>>, vector<32x32xf32>
    %cst = arith.constant dense<0.000000e+00> : vector<8x32xf32>
    %2 = tpu.matmul %0, %1, %cst {dimension_numbers = #tpu.dot_dimension_numbers<[1], [0], [0], [1], [0, 0, 1, 1], [], []>} : vector<8x32xf32>, vector<32x32xf32>, vector<8x32xf32> -> vector<8x32xf32>
    %cst_3 = arith.constant 0.000000e+00 : f32
    %3 = vector.broadcast %cst_3 : f32 to vector<8x32xf32>
    %4 = arith.maximumf %2, %3 : vector<8x32xf32>
    %c0_4 = arith.constant 0 : index
    %c0_5 = arith.constant 0 : index
    %5 = vector.load %arg3[%c0_4, %c0_5] : memref<8x32xf32, #tpu.memory_space<vmem>>, vector<8x32xf32>
    tpu.vector_store %arg3[%c0_4, %c0_5], %4 {strides = array<i32>} : memref<8x32xf32, #tpu.memory_space<vmem>>, vector<8x32xf32>,
    return
  }
  func.func @transform_0(%arg0: i32) -> (i32, i32) {
    %c0_i32 = arith.constant 0 : i32
    %c0_i32_0 = arith.constant 0 : i32
    return %arg0, %c0_i32 : i32, i32
  }
  func.func @transform_1(%arg0: i32) -> (i32, i32) {
    %c0_i32 = arith.constant 0 : i32
    %c0_i32_0 = arith.constant 0 : i32
    %c0_i32_1 = arith.constant 0 : i32
    return %c0_i32, %c0_i32_0 : i32, i32
  }
  func.func @transform_2(%arg0: i32) -> (i32, i32) {
    %c0_i32 = arith.constant 0 : i32
    %c0_i32_0 = arith.constant 0 : i32
    return %arg0, %c0_i32 : i32, i32
  }
}

</mosaic_0001>

<bundles_post_ra>
// kernel: _linear_relu_fast.1
= control target key start
LH: loop header
LB: loop body
LE: loop exit
PB: predicated region body
PF: predicated region fallthrough
CT: control target
= control target key end

     0   :  { %7 = vsyncpa [#allocation3], 0  ;;  %s204_s0 = inlined_call_operand.hbm [shape: f32[8,32], index: 0, kind: input, shape index: {}]   ;;  %s205_s1 = inlined_call_operand.hbm [shape: f32[32,32], index: 1, kind: input, shape index: {}]   ;;  %s206_s2 = inlined_call_operand.hbm [shape: f32[8,32], index: 2, kind: output, shape index: {}]  }
   0x1   :  { %8 = vsyncpa [#allocation6], 0 }
   0x2   :  { %9 = vsyncpa [#allocation4], 0  ;;  %s15_s11 = sshll.u32 %s204_s0, 4  ;;  %s175_s12 = smov [#allocation2]   ;;  %s16_s11 = int_to_ptr.hbm [resolvable:$true] %s15_s11 }
   0x3   :  { %s17_s13 = sshll.u32 %s175_s12, 4  ;;  %s25_s16 = sshll.u32 %s205_s1, 4  ;;  %s18_s13 = int_to_ptr.vmem [resolvable:$true] %s17_s13  ;;  %s26_s16 = int_to_ptr.hbm [resolvable:$true] %s25_s16 }
   0x4   :  { %20 = dma.hbm_to_vmem [thread:$0]  %s16_s11, 128, %s18_s13, [#allocation3]  }
   0x5   :  { %s176_s17 = smov [#allocation5]   ;;  %s177_s19 = smov 128  }
   0x6   :  { %s27_s18 = sshll.u32 %s176_s17, 4  ;;  %s178_s20 = smov 8   ;;  %s28_s18 = int_to_ptr.vmem [resolvable:$true] %s27_s18 }
   0x7   :  { %33 = dma.hbm_to_vmem [thread:$0]  %s26_s16, 512, %s28_s18, [#allocation6], %s177_s19, %s177_s19, %s178_s20  }
   0x8   :  { %169 = dma.done.wait [#allocation3], 128  }
   0x9   :  { %170 = vsyncadd [#allocation3], 4294967168 }
   0xa   :  { %171 = dma.done.wait [#allocation6], 512  }
   0xb   :  { %172 = vsyncadd [#allocation6], 4294966784  ;;  %v46_v0 = vld [vmem:[#allocation5 + $0x18] sm:$0xff]  ;;  %v45_v1 = vld [vmem:[#allocation5 + $0x10] sm:$0xff]  ;;  %vm47_vm0 = vcmask 261120   ;;  %s179_s0 = smov [#allocation7]  }
   0xc   :  { %63 = vmatpush.msra.mxu0 %v46_v0  ;;  %v44_v2 = vld [vmem:[#allocation5 + $0x8] sm:$0xff]  ;;  %v43_v3 = vld [vmem:[#allocation5] sm:$0xff]  ;;  %v42_v4 = vld [vmem:[#allocation2] sm:$0xff]  ;;  %s78_s1 = sshll.u32 %s179_s0, 4  ;;  %s80_s23 = sshll.u32 %s206_s2, 4  ;;  %s79_s1 = int_to_ptr.vmem [resolvable:$true] %s78_s1  ;;  %s81_s23 = int_to_ptr.hbm [resolvable:$true] %s80_s23 }
   0xe   :  { %64 = vmatpush.msra.mxu0 %v45_v1 }
  0x10   :  { %65 = vmatpush.msra.mxu0 %v44_v2 }
  0x12   :  { %66 = vmatpush.msra.mxu0 %v43_v3 }
  0x13   :  { %91 = vmatmul.msk.f32.vlgmr.msra.gmra.mxu0 %vm47_vm0, %v42_v4 }
  0x90   :  { %v68_v5 = vpop.f32.mrf.mxu0 }
  0x91   :  { %v71_v6 = vmax.f32 %v68_v5, 0.0 }
  0x93   :  { %72 = vst.msk [vmem:[#allocation7] sm:$0xff] %vm47_vm0, %v71_v6 }
  0x94   :  { %83 = dma.vmem_to_hbm [thread:$0]  %s79_s1, 128, %s81_s23, [#allocation4]  }
  0x95   :  { %173 = dma.done.wait [#allocation4], 128  }
  0x96   :  { %174 = vsyncadd [#allocation4], 4294967168 }
  0x97   :  { %88 = vsyncpa [#allocation3], 1 }
  0x98   :  { %89 = vsyncpa [#allocation6], 1 }
  0x99   :  { %90 = vsyncpa [#allocation4], 1 }

</bundles_post_ra>
